<compile_context>
chip_gen: v5e
topology: v5e:2x2
jax: 0.10.0
libtpu: 0.0.40
codegen_flags: <defaults>
</compile_context>

<pallas_src>
import jax
import jax.numpy as jnp
from jax.experimental import pallas as pl
from jax.experimental.pallas import tpu as pltpu


def _sigmoid(t):
    # Exact sigmoid; exp goes to the EUP, the divide is cheap and exact.
    return 1.0 / (1.0 + jnp.exp(-t))


def ham_kernel(x_ref, w1_ref, b1_ref, w2_ref, b2_ref, ws_ref, bs_ref, out_ref):
    x = x_ref[...]                                   # (B, C, S), S lane-dense

    # ---- channel attention: GAP -> 1x1 -> ReLU -> 1x1 -> sigmoid ----
    gap = jnp.mean(x, axis=-1)                       # (B, C)  lane reduce over S

    # FC1: h[n,j] = relu(sum_c W1[j,c] * gap[n,c] + b1[j])   (VPU mul + reduce)
    h = jnp.maximum(
        jnp.sum(gap[:, None, :] * w1_ref[...][None, :, :], axis=-1)
        + b1_ref[...], 0.0)                          # (B, Ch)

    # FC2: ca[n,c] = sigmoid(sum_j W2[c,j] * h[n,j] + b2[c])
    ca = _sigmoid(
        jnp.sum(h[:, None, :] * w2_ref[...][None, :, :], axis=-1)
        + b2_ref[...])                               # (B, C)

    # ---- spatial attention: 1x1 conv C -> 1, sublane reduce over C ----
    sa = _sigmoid(
        jnp.sum(x * ws_ref[...][None, :, :], axis=1, keepdims=True)
        + bs_ref[0])                                 # (B, 1, S)

    # out = x*ca + x*sa == x * (ca + sa): one fused lane-dense VPU multiply.
    out_ref[...] = x * (ca[:, :, None] + sa)


def ham_forward(x_nchw, params):
    """x_nchw: (N, C, H, W) float32, matching the PyTorch module's layout."""
    N, C, H, W = x_nchw.shape
    S = H * W
    x3 = x_nchw.reshape(N, C, S)

    # Batch tile: as many images per grid step as fit a modest VMEM budget
    # (in+out double-buffered must stay well under v7x's 32 MiB scoped limit).
    per_image_bytes = C * S * 4
    budget_bytes = 2 * 1024 * 1024
    bt = max(1, min(N, budget_bytes // max(per_image_bytes, 1)))
    while N % bt != 0:
        bt -= 1
    grid = (N // bt,)

    w1 = params["wc1"]                    # (Ch, C)
    b1 = params["bc1"].reshape(1, -1)     # (1, Ch)
    w2 = params["wc2"]                    # (C, Ch)
    b2 = params["bc2"].reshape(1, -1)     # (1, C)
    ws = params["ws"].reshape(-1, 1)      # (C, 1)
    bs = params["bs"].reshape(1)          # (1,) scalar -> SMEM

    def full_vmem(a):
        nd = a.ndim
        return pl.BlockSpec(a.shape, lambda n, _nd=nd: (0,) * _nd)

    in_specs = [
        pl.BlockSpec((bt, C, S), lambda n: (n, 0, 0)),   # x, lane-dense over S
        full_vmem(w1), full_vmem(b1),
        full_vmem(w2), full_vmem(b2),
        full_vmem(ws),
        pl.BlockSpec(memory_space=pltpu.MemorySpace.SMEM),  # scalar bias
    ]

    out = pl.pallas_call(
        ham_kernel,
        out_shape=jax.ShapeDtypeStruct((N, C, S), jnp.float32),
        grid=grid,
        in_specs=in_specs,
        out_specs=pl.BlockSpec((bt, C, S), lambda n: (n, 0, 0)),
        compiler_params=pltpu.CompilerParams(
            dimension_semantics=("parallel",)),   # megacore split for larger N
    )(x3, w1, b1, w2, b2, ws, bs)
    return out.reshape(N, C, H, W)


def ref_forward(x, params):
    """Plain-JAX NCHW reference mirroring the PyTorch module forward."""
    gap = jnp.mean(x, axis=(2, 3), keepdims=True)                       # (N,C,1,1)
    h = jax.nn.relu(
        jnp.einsum("nchw,dc->ndhw", gap, params["wc1"])
        + params["bc1"][None, :, None, None])                           # (N,Ch,1,1)
    ca = jax.nn.sigmoid(
        jnp.einsum("ndhw,cd->nchw", h, params["wc2"])
        + params["bc2"][None, :, None, None])                           # (N,C,1,1)
    sa = jax.nn.sigmoid(
        jnp.einsum("nchw,c->nhw", x, params["ws"])[:, None, :, :]
        + params["bs"][None, :, None, None])                            # (N,1,H,W)
    return x * ca + x * sa


if __name__ == "__main__":
    key = jax.random.PRNGKey(0)
    kx, k1, k2, k3, k4, k5, k6 = jax.random.split(key, 7)

    # HierarchicalAttentionMechanism(in_channels=16) on a 16x16 feature map.
    N, C, H, W = 2, 16, 16, 16
    Ch = C // 8

    x = jax.random.normal(kx, (N, C, H, W), jnp.float32)
    params = dict(
        wc1=jax.random.normal(k1, (Ch, C), jnp.float32) * 0.1,   # Conv2d(C, Ch, 1)
        bc1=jax.random.normal(k2, (Ch,), jnp.float32) * 0.1,
        wc2=jax.random.normal(k3, (C, Ch), jnp.float32) * 0.1,   # Conv2d(Ch, C, 1)
        bc2=jax.random.normal(k4, (C,), jnp.float32) * 0.1,
        ws=jax.random.normal(k5, (C,), jnp.float32) * 0.1,       # Conv2d(C, 1, 1)
        bs=jax.random.normal(k6, (1,), jnp.float32) * 0.1,
    )

    out = jax.block_until_ready(ham_forward(x, params))
    ref = jax.block_until_ready(ref_forward(x, params))

    assert out.shape == (N, C, H, W)
    err = float(jnp.max(jnp.abs(out - ref)))
    assert err < 1e-4, f"kernel vs reference mismatch: max abs err = {err}"
    print("KERNEL_OK")
</pallas_src>

<mosaic_0001>
module attributes {stable_mosaic.version = 11 : i64} {
  func.func @ham_kernel(%arg0: i32, %arg1: memref<2x16x256xf32, #tpu.memory_space<vmem>>, %arg2: memref<2x16xf32, #tpu.memory_space<vmem>>, %arg3: memref<1x2xf32, #tpu.memory_space<vmem>>, %arg4: memref<16x2xf32, #tpu.memory_space<vmem>>, %arg5: memref<1x16xf32, #tpu.memory_space<vmem>>, %arg6: memref<16x1xf32, #tpu.memory_space<vmem>>, %arg7: memref<1xf32, #tpu.memory_space<smem>>, %arg8: memref<2x16x256xf32, #tpu.memory_space<vmem>>) attributes {dimension_semantics = [#tpu.dimension_semantics<parallel>], iteration_bounds = array<i64: 1>, scalar_prefetch = 0 : i64, scratch_operands = 0 : i64, tpu.core_type = #tpu.core_type<tc>, window_params = [{transform_indices = @transform_0, window_bounds = array<i64: 2, 16, 256>}, {pipeline_mode = #tpu.pipeline_mode<synchronous>, transform_indices = @transform_1, window_bounds = array<i64: 2, 16>}, {pipeline_mode = #tpu.pipeline_mode<synchronous>, transform_indices = @transform_2, window_bounds = array<i64: 1, 2>}, {pipeline_mode = #tpu.pipeline_mode<synchronous>, transform_indices = @transform_3, window_bounds = array<i64: 16, 2>}, {pipeline_mode = #tpu.pipeline_mode<synchronous>, transform_indices = @transform_4, window_bounds = array<i64: 1, 16>}, {pipeline_mode = #tpu.pipeline_mode<synchronous>, transform_indices = @transform_5, window_bounds = array<i64: 16, 1>}, {transform_indices = @transform_6, window_bounds = array<i64: 1>}, {transform_indices = @transform_7, window_bounds = array<i64: 2, 16, 256>}]} {
    %c0 = arith.constant 0 : index
    %c0_0 = arith.constant 0 : index
    %c0_1 = arith.constant 0 : index
    %0 = vector.load %arg1[%c0, %c0_0, %c0_1] : memref<2x16x256xf32, #tpu.memory_space<vmem>>, vector<2x16x256xf32>
    %cst = arith.constant dense<0.000000e+00> : vector<2x16xf32>
    %1 = vector.multi_reduction <add>, %0, %cst [2] : vector<2x16x256xf32> to vector<2x16xf32>
    %cst_2 = arith.constant 2.560000e+02 : f32
    %2 = vector.broadcast %cst_2 : f32 to vector<2x16xf32>
    %3 = arith.divf %1, %2 : vector<2x16xf32>
    %4 = vector.shape_cast %3 : vector<2x16xf32> to vector<2x1x16xf32>
    %c0_3 = arith.constant 0 : index
    %c0_4 = arith.constant 0 : index
    %5 = vector.load %arg2[%c0_3, %c0_4] : memref<2x16xf32, #tpu.memory_space<vmem>>, vector<2x16xf32>
    %6 = vector.shape_cast %5 : vector<2x16xf32> to vector<1x2x16xf32>
    %7 = vector.broadcast %4 : vector<2x1x16xf32> to vector<2x2x16xf32>
    %8 = vector.broadcast %6 : vector<1x2x16xf32> to vector<2x2x16xf32>
    %9 = arith.mulf %7, %8 : vector<2x2x16xf32>
    %cst_5 = arith.constant dense<0.000000e+00> : vector<2x2xf32>
    %10 = vector.multi_reduction <add>, %9, %cst_5 [2] : vector<2x2x16xf32> to vector<2x2xf32>
    %c0_6 = arith.constant 0 : index
    %c0_7 = arith.constant 0 : index
    %11 = vector.load %arg3[%c0_6, %c0_7] : memref<1x2xf32, #tpu.memory_space<vmem>>, vector<1x2xf32>
    %12 = vector.broadcast %11 : vector<1x2xf32> to vector<2x2xf32>
    %13 = arith.addf %10, %12 : vector<2x2xf32>
    %cst_8 = arith.constant 0.000000e+00 : f32
    %14 = vector.broadcast %cst_8 : f32 to vector<2x2xf32>
    %15 = arith.maximumf %13, %14 : vector<2x2xf32>
    %16 = vector.shape_cast %15 : vector<2x2xf32> to vector<2x1x2xf32>
    %c0_9 = arith.constant 0 : index
    %c0_10 = arith.constant 0 : index
    %17 = vector.load %arg4[%c0_9, %c0_10] : memref<16x2xf32, #tpu.memory_space<vmem>>, vector<16x2xf32>
    %18 = vector.shape_cast %17 : vector<16x2xf32> to vector<1x16x2xf32>
    %19 = vector.broadcast %16 : vector<2x1x2xf32> to vector<2x16x2xf32>
    %20 = vector.broadcast %18 : vector<1x16x2xf32> to vector<2x16x2xf32>
    %21 = arith.mulf %19, %20 : vector<2x16x2xf32>
    %cst_11 = arith.constant dense<0.000000e+00> : vector<2x16xf32>
    %22 = vector.multi_reduction <add>, %21, %cst_11 [2] : vector<2x16x2xf32> to vector<2x16xf32>
    %c0_12 = arith.constant 0 : index
    %c0_13 = arith.constant 0 : index
    %23 = vector.load %arg5[%c0_12, %c0_13] : memref<1x16xf32, #tpu.memory_space<vmem>>, vector<1x16xf32>
    %24 = vector.broadcast %23 : vector<1x16xf32> to vector<2x16xf32>
    %25 = arith.addf %22, %24 : vector<2x16xf32>
    %cst_14 = arith.constant 0.000000e+00 : f32
    %26 = vector.broadcast %cst_14 : f32 to vector<2x16xf32>
    %27 = arith.subf %26, %25 : vector<2x16xf32>
    %28 = math.exp %27 : vector<2x16xf32>
    %cst_15 = arith.constant 1.000000e+00 : f32
    %29 = vector.broadcast %cst_15 : f32 to vector<2x16xf32>
    %30 = arith.addf %29, %28 : vector<2x16xf32>
    %cst_16 = arith.constant 1.000000e+00 : f32
    %31 = vector.broadcast %cst_16 : f32 to vector<2x16xf32>
    %32 = arith.divf %31, %30 : vector<2x16xf32>
    %c0_17 = arith.constant 0 : index
    %c0_18 = arith.constant 0 : index
    %33 = vector.load %arg6[%c0_17, %c0_18] : memref<16x1xf32, #tpu.memory_space<vmem>>, vector<16x1xf32>
    %34 = vector.shape_cast %33 : vector<16x1xf32> to vector<1x16x1xf32>
    %35 = vector.broadcast %34 : vector<1x16x1xf32> to vector<2x16x256xf32>
    %36 = arith.mulf %0, %35 : vector<2x16x256xf32>
    %cst_19 = arith.constant dense<0.000000e+00> : vector<2x256xf32>
    %37 = vector.multi_reduction <add>, %36, %cst_19 [1] : vector<2x16x256xf32> to vector<2x256xf32>
    %38 = vector.shape_cast %37 : vector<2x256xf32> to vector<2x1x256xf32>
    %c0_20 = arith.constant 0 : index
    %39 = memref.load %arg7[%c0_20] : memref<1xf32, #tpu.memory_space<smem>>
    %40 = vector.broadcast %39 : f32 to vector<2x1x256xf32>
    %41 = arith.addf %38, %40 : vector<2x1x256xf32>
    %cst_21 = arith.constant 0.000000e+00 : f32
    %42 = vector.broadcast %cst_21 : f32 to vector<2x1x256xf32>
    %43 = arith.subf %42, %41 : vector<2x1x256xf32>
    %44 = math.exp %43 : vector<2x1x256xf32>
    %cst_22 = arith.constant 1.000000e+00 : f32
    %45 = vector.broadcast %cst_22 : f32 to vector<2x1x256xf32>
    %46 = arith.addf %45, %44 : vector<2x1x256xf32>
    %cst_23 = arith.constant 1.000000e+00 : f32
    %47 = vector.broadcast %cst_23 : f32 to vector<2x1x256xf32>
    %48 = arith.divf %47, %46 : vector<2x1x256xf32>
    %49 = vector.shape_cast %32 : vector<2x16xf32> to vector<2x16x1xf32>
    %50 = vector.broadcast %49 : vector<2x16x1xf32> to vector<2x16x256xf32>
    %51 = vector.broadcast %48 : vector<2x1x256xf32> to vector<2x16x256xf32>
    %52 = arith.addf %50, %51 : vector<2x16x256xf32>
    %53 = arith.mulf %0, %52 : vector<2x16x256xf32>
    %c0_24 = arith.constant 0 : index
    %c0_25 = arith.constant 0 : index
    %c0_26 = arith.constant 0 : index
    %54 = vector.load %arg8[%c0_24, %c0_25, %c0_26] : memref<2x16x256xf32, #tpu.memory_space<vmem>>, vector<2x16x256xf32>
    tpu.vector_store %arg8[%c0_24, %c0_25, %c0_26], %53 {strides = array<i32>} : memref<2x16x256xf32, #tpu.memory_space<vmem>>, vector<2x16x256xf32>,
    return
  }
  func.func @transform_0(%arg0: i32) -> (i32, i32, i32) {
    %c0_i32 = arith.constant 0 : i32
    %c0_i32_0 = arith.constant 0 : i32
    %c0_i32_1 = arith.constant 0 : i32
    return %arg0, %c0_i32, %c0_i32_0 : i32, i32, i32
  }
  func.func @transform_1(%arg0: i32) -> (i32, i32) {
    %c0_i32 = arith.constant 0 : i32
    %c0_i32_0 = arith.constant 0 : i32
    %c0_i32_1 = arith.constant 0 : i32
    return %c0_i32, %c0_i32_0 : i32, i32
  }
  func.func @transform_2(%arg0: i32) -> (i32, i32) {
    %c0_i32 = arith.constant 0 : i32
    %c0_i32_0 = arith.constant 0 : i32
    %c0_i32_1 = arith.constant 0 : i32
    return %c0_i32, %c0_i32_0 : i32, i32
  }
  func.func @transform_3(%arg0: i32) -> (i32, i32) {
    %c0_i32 = arith.constant 0 : i32
    %c0_i32_0 = arith.constant 0 : i32
    %c0_i32_1 = arith.constant 0 : i32
    return %c0_i32, %c0_i32_0 : i32, i32
  }
  func.func @transform_4(%arg0: i32) -> (i32, i32) {
    %c0_i32 = arith.constant 0 : i32
    %c0_i32_0 = arith.constant 0 : i32
    %c0_i32_1 = arith.constant 0 : i32
    return %c0_i32, %c0_i32_0 : i32, i32
  }
  func.func @transform_5(%arg0: i32) -> (i32, i32) {
    %c0_i32 = arith.constant 0 : i32
    %c0_i32_0 = arith.constant 0 : i32
    %c0_i32_1 = arith.constant 0 : i32
    return %c0_i32, %c0_i32_0 : i32, i32
  }
  func.func @transform_6(%arg0: i32) -> i32 {
    %c0_i32 = arith.constant 0 : i32
    %c0_i32_0 = arith.constant 0 : i32
    return %c0_i32 : i32
  }
  func.func @transform_7(%arg0: i32) -> (i32, i32, i32) {
    %c0_i32 = arith.constant 0 : i32
    %c0_i32_0 = arith.constant 0 : i32
    %c0_i32_1 = arith.constant 0 : i32
    return %arg0, %c0_i32, %c0_i32_0 : i32, i32, i32
  }
}

</mosaic_0001>

<bundles_post_ra>
// kernel: tpu_custom_call.1
= control target key start
LH: loop header
LB: loop body
LE: loop exit
PB: predicated region body
PF: predicated region fallthrough
CT: control target
= control target key end

     0   :  { %13 = vsyncpa [#allocation4], 0  ;;  %s1314_s0 = inlined_call_operand.hbm [shape: f32[2,16,256], index: 0, kind: input, shape index: {}]   ;;  %s1315_s1 = inlined_call_operand.vmem [shape: f32[2,16], index: 1, kind: input, shape index: {}]   ;;  %s1316_s2 = inlined_call_operand.vmem [shape: f32[1,2], index: 2, kind: input, shape index: {}]   ;;  %s1317_s3 = inlined_call_operand.vmem [shape: f32[16,2], index: 3, kind: input, shape index: {}]   ;;  %s1318_s4 = inlined_call_operand.vmem [shape: f32[1,16], index: 4, kind: input, shape index: {}]   ;;  %s1319_s5 = inlined_call_operand.vmem [shape: f32[16,1], index: 5, kind: input, shape index: {}]   ;;  %s1320_s6 = inlined_call_operand.<no memory space> [shape: f32[1], index: 6, kind: input, shape index: {}]   ;;  %s1321_s7 = inlined_call_operand.hbm [shape: f32[2,16,256], index: 7, kind: output, shape index: {}]  }
   0x1   :  { %14 = vsyncpa [#allocation5], 0  ;;  %s19_s26 = sshll.u32 %s1314_s0, 4  ;;  %s969_s27 = smov [#allocation3]   ;;  %s20_s26 = int_to_ptr.hbm [resolvable:$true] %s19_s26 }
   0x2   :  { %s21_s28 = sshll.u32 %s969_s27, 4  ;;  %s970_s29 = smov 256   ;;  %s22_s28 = int_to_ptr.vmem [resolvable:$true] %s21_s28 }
   0x3   :  { %s971_s30 = smov 16  }
   0x4   :  { %27 = dma.hbm_to_vmem [thread:$0]  %s20_s26, 1024, %s22_s28, [#allocation4], %s970_s29, %s970_s29, %s971_s30  }
   0x5   :  { %965 = dma.done.wait [#allocation4], 1024  }
   0x6   :  { %966 = vsyncadd [#allocation4], 4294966272  ;;  %v78_v0 = vlaneseq  ;;  %v1030_v3 = vld [vmem:[#allocation3 + $0x20] sm:$0xff]  ;;  %v1032_v4 = vld [vmem:[#allocation3 + $0x28] sm:$0xff]  ;;  %v972_v34 = vmov 0   ;;  %v973_v36 = vmov 256.0  }
   0x7   :  { %v1034_v5 = vld [vmem:[#allocation3] sm:$0xff]  ;;  %v58_v6 = vadd.f32 %v1032_v4, %v1030_v3  ;;  %v1038_v7 = vld [vmem:[#allocation3 + $0x8] sm:$0xff]  ;;  %v1045_v11 = vld [vmem:[#allocation3 + $0x30] sm:$0xff]  ;;  %875 = vrcp.f32 %v973_v36  ;;  %vm152_vm1 = vcmask 130112   ;;  %vm163_vm2 = vcmask 1041409   ;;  %s841_s21 = sshll.u32 %s1321_s7, 4  ;;  %s842_s21 = int_to_ptr.hbm [resolvable:$true] %s841_s21 }
   0x8   :  { %v1022_v1 = vshrl.u32 %v78_v0, 7  ;;  %v52_v8 = vadd.f32 %v1038_v7, %v1034_v5  ;;  %v75_v9 = vld [vmem:[%s1315_s1] sm:$0x3]  ;;  %v1047_v12 = vld [vmem:[#allocation3 + $0x38] sm:$0xff]  ;;  %v1049_v13 = vld [vmem:[#allocation3 + $0x10] sm:$0xff]  ;;  %vm168_vm3 = vcmask 123904  }
   0x9   :  { %59 = vadd.xlane.f32.xlu1 %v58_v6  ;;  %v77_v10 = vperm.slane %v75_v9, 0  ;;  %v1051_v14 = vld [vmem:[#allocation3 + $0x18] sm:$0xff]  ;;  %v61_v15 = vadd.f32 %v1047_v12, %v1045_v11  ;;  %v90_v17 = vperm.slane %v75_v9, 1  ;;  %v873_v18 = vld [vmem:[%s1316_s2] ss:$0 sm:$0xff]  ;;  %v190_v25 = vld [vmem:[%s1317_s3 + $0x8] sm:$0xff] }
   0xa   :  { %860 = vset.pattern.permute.xlu2 %v1022_v1  ;;  %861 = vset.pattern.permute.xlu0 %v1022_v1  ;;  %v1027_v2 = vadd.s32 8, %v1022_v1  ;;  %v55_v16 = vadd.f32 %v1051_v14, %v1049_v13  ;;  %v189_v19 = vld [vmem:[%s1317_s3] sm:$0xff]  ;;  %v263_v26 = vperm.slane %v190_v25, 2  ;;  %v284_v29 = vperm.slane %v190_v25, 5 }
   0xb   :  { %53 = vadd.xlane.f32.xlu0 %v52_v8  ;;  %v193_v20 = vperm.slane %v189_v19, 0  ;;  %v207_v21 = vperm.slane %v189_v19, 2  ;;  %v200_v22 = vperm.slane %v189_v19, 1  ;;  %v242_v23 = vperm.slane %v189_v19, 7  ;;  %v1078_v9 = vld [vmem:[%s1318_s4] ss:$0 sm:$0xff] }
   0xc   :  { %863 = vset.pattern.permute.xlu1 %v1027_v2  ;;  %v221_v24 = vperm.slane %v189_v19, 4  ;;  %v214_v27 = vperm.slane %v189_v19, 3  ;;  %v228_v28 = vperm.slane %v189_v19, 5  ;;  %v249_v30 = vperm.slane %v190_v25, 0 }
   0xd   :  { %v235_v31 = vperm.slane %v189_v19, 6  ;;  %v270_v32 = vperm.slane %v190_v25, 3  ;;  %v256_v33 = vperm.slane %v190_v25, 1  ;;  %v277_v35 = vperm.slane %v190_v25, 4  ;;  %v876_v38 = vpop.eup %875 }
   0xe   :  { %v291_v37 = vperm.slane %v190_v25, 6  ;;  %v298_v39 = vperm.slane %v190_v25, 7  ;;  %v65_v40 = vmul.f32 256.0, %v876_v38  ;;  %vm69_vm0 = vweird.f32 %v876_v38 }
   0xf   :  { %vm514_vm4 = vcmask 1042434   ;;  %vm516_vm5 = vcmask 1043459   ;;  %vm518_vm6 = vcmask 1044484   ;;  %vm520_vm7 = vcmask 1045509  }
  0x10   :  { %v66_v41 = vsub.f32 1.0, %v65_v40  ;;  %vm522_vm8 = vcmask 1046534   ;;  %vm524_vm9 = vcmask 1047559   ;;  %vm551_vm10 = vcmask 15360  }
  0x11   :  { %62 = vadd.xlane.f32.xlu1 %v61_v15 }
  0x12   :  { %82 = vperm.xlu2 %860, %v77_v10   ;;  %v67_v42 = vmul.f32 %v876_v38, %v66_v41 }
  0x13   :  { %56 = vadd.xlane.f32.xlu0 %v55_v16 }
  0x14   :  { %v68_v43 = vadd.f32 %v876_v38, %v67_v42 }
  0x16   :  { %v70_v44 = vsel %vm69_vm0, %v876_v38, %v68_v43 }
  0x1a   :  { %862 = vset.pattern.permute.xlu2 %v1027_v2 }
  0x22   :  { %88 = vperm.xlu2 %862, %v77_v10  }
  0x27   :  { %95 = vperm.xlu0 %861, %v90_v17  }
  0x2a   :  { %864 = vset.pattern.permute.xlu2 %v1022_v1  ;;  %101 = vperm.xlu1 %863, %v90_v17  }
  0x2f   :  { %182 = vperm.xlu0 %861, %v873_v18  }
  0x32   :  { %865 = vset.pattern.permute.xlu1 %v1022_v1  ;;  %212 = vperm.xlu2 %864, %v207_v21  }
  0x37   :  { %198 = vperm.xlu0 %861, %v193_v20  }
  0x3a   :  { %247 = vperm.xlu2 %864, %v242_v23   ;;  %219 = vperm.xlu1 %865, %v214_v27  }
  0x3f   :  { %205 = vperm.xlu0 %861, %v200_v22  }
  0x42   :  { %268 = vperm.xlu2 %864, %v263_v26   ;;  %254 = vperm.xlu1 %865, %v249_v30   ;;  %v1111_v30 = vand.u32 127, %v78_v0 }
  0x47   :  { %226 = vperm.xlu0 %861, %v221_v24  }
  0x4a   :  { %289 = vperm.xlu2 %864, %v284_v29   ;;  %275 = vperm.xlu1 %865, %v270_v32   ;;  %v150_v32 = vadd.s32 4294967288, %v1111_v30 }
  0x4f   :  { %233 = vperm.xlu0 %861, %v228_v28  }
  0x52   :  { %866 = vset.pattern.permute.xlu2 %v972_v34  ;;  %296 = vperm.xlu1 %865, %v291_v37  }
  0x57   :  { %240 = vperm.xlu0 %861, %v235_v31  }
  0x5a   :  { %867 = vset.pattern.permute.xlu1 %v972_v34 }
  0x5f   :  { %261 = vperm.xlu0 %861, %v256_v33  }
  0x67   :  { %282 = vperm.xlu0 %861, %v277_v35  }
  0x6c   :  { %v83_v47 = vpop.permute.xlu2 %82 }
  0x6f   :  { %303 = vperm.xlu0 %861, %v298_v39  }
  0x77   :  { %868 = vset.pattern.permute.xlu0 %v972_v34 }
  0x7c   :  { %v60_v45 = vpop.xlane.xlu1 %59  ;;  %v89_v61 = vpop.permute.xlu2 %88 }
  0x7d   :  { %v73_v48 = vmul.f32 %v70_v44, %v60_v45 }
  0x7e   :  { %v54_v46 = vpop.xlane.xlu0 %53 }
  0x7f   :  { %v71_v49 = vmul.f32 %v70_v44, %v54_v46  ;;  %v111_v50 = vmul.f32 %v83_v47, %v73_v48 }
  0x81   :  { %v107_v51 = vmul.f32 %v83_v47, %v71_v49  ;;  %136 = vperm.xlu1 %867, %v111_v50  }
  0x83   :  { %124 = vperm.xlu2 %866, %v107_v51  }
  0x84   :  { %v63_v53 = vpop.xlane.xlu1 %62 }
  0x85   :  { %v74_v57 = vmul.f32 %v70_v44, %v63_v53 }
  0x86   :  { %v57_v52 = vpop.xlane.xlu0 %56 }
  0x87   :  { %v72_v59 = vmul.f32 %v70_v44, %v57_v52  ;;  %v112_v6 = vmul.f32 %v89_v61, %v74_v57 }
  0x89   :  { %v108_v62 = vmul.f32 %v89_v61, %v72_v59 }
  0x8c   :  { %v1083_v15 = vpop.permute.xlu2 %212 }
  0x94   :  { %v1088_v16 = vpop.permute.xlu2 %247 }
  0x99   :  { %v96_v54 = vpop.permute.xlu0 %95 }
  0x9a   :  { %v109_v55 = vmul.f32 %v96_v54, %v71_v49  ;;  %v113_v56 = vmul.f32 %v96_v54, %v73_v48 }
  0x9c   :  { %142 = vperm.xlu1 %867, %v113_v56   ;;  %130 = vperm.xlu2 %866, %v109_v55   ;;  %v102_v58 = vpop.permute.xlu1 %101  ;;  %v1092_v18 = vpop.permute.xlu2 %268 }
  0x9d   :  { %v114_v60 = vmul.f32 %v102_v58, %v74_v57  ;;  %v110_v63 = vmul.f32 %v102_v58, %v72_v59 }
  0x9f   :  { %145 = vperm.xlu0 %868, %v114_v60  }
  0xa1   :  { %v1073_v8 = vpop.permute.xlu0 %182 }
  0xa4   :  { %127 = vperm.xlu2 %866, %v108_v62   ;;  %869 = vset.pattern.permute.xlu1 %v1022_v1  ;;  %v1098_v21 = vpop.permute.xlu2 %289 }
  0xa9   :  { %v1081_v10 = vpop.permute.xlu0 %198 }
  0xac   :  { %133 = vperm.xlu2 %866, %v110_v63   ;;  %571 = vperm.xlu1 %869, %v1078_v9   ;;  %v1094_v19 = vpop.permute.xlu1 %219 }
  0xb1   :  { %v1086_v1 = vpop.permute.xlu0 %205 }
  0xb4   :  { %139 = vperm.xlu2 %866, %v112_v6   ;;  %870 = vset.pattern.permute.xlu1 %v972_v34  ;;  %v1100_v22 = vpop.permute.xlu1 %254 }
  0xb9   :  { %v1090_v17 = vpop.permute.xlu0 %226 }
  0xbc   :  { %v1104_v25 = vpop.permute.xlu1 %275 }
  0xc1   :  { %v1096_v20 = vpop.permute.xlu0 %233 }
  0xc4   :  { %v1108_v28 = vpop.permute.xlu1 %296 }
  0xc9   :  { %v1102_v23 = vpop.permute.xlu0 %240 }
  0xd1   :  { %v1106_v26 = vpop.permute.xlu0 %261 }
  0xd9   :  { %v1113_v31 = vpop.permute.xlu0 %282 }
  0xdd   :  { %v125_v24 = vpop.permute.xlu2 %124 }
  0xde   :  { %v149_v36 = vperm.slane %v125_v24, %v1111_v30 }
  0xe1   :  { %v1120_v41 = vpop.permute.xlu0 %303 }
  0xf3   :  { %v137_v39 = vpop.permute.xlu1 %136 }
  0xf4   :  { %v157_v48 = vperm.slane %v137_v39, %v1111_v30 }
  0xf6   :  { %v131_v27 = vpop.permute.xlu2 %130 }
  0xf7   :  { %v154_v37 = vperm.slane %v131_v27, %v1111_v30 }
  0xfe   :  { %v128_v29 = vpop.permute.xlu2 %127 }
  0xff   :  { %v151_v33 = vperm.slane %v128_v29, %v150_v32 }
 0x101   :  { %v153_v40 = vsel %vm152_vm1, %v151_v33, %v149_v36 }
 0x106   :  { %v134_v35 = vpop.permute.xlu2 %133 }
 0x107   :  { %v155_v38 = vperm.slane %v134_v35, %v150_v32 }
 0x109   :  { %v156_v0 = vsel %vm152_vm1, %v155_v38, %v154_v37 }
 0x10a   :  { %v164_v42 = vsel %vm163_vm2, %v156_v0, %v153_v40 }
 0x10b   :  { %v169_v43 = vsel %vm168_vm3, %v164_v42, 0.0 }
 0x10c   :  { %170 = vadd.xlane.f32.xlu2 %v169_v43 }
 0x10e   :  { %v140_v44 = vpop.permute.xlu2 %139  ;;  %v143_v45 = vpop.permute.xlu1 %142 }
 0x10f   :  { %v158_v46 = vperm.slane %v140_v44, %v150_v32  ;;  %v160_v49 = vperm.slane %v143_v45, %v1111_v30 }
 0x111   :  { %v146_v47 = vpop.permute.xlu0 %145  ;;  %v159_v51 = vsel %vm152_vm1, %v158_v46, %v157_v48 }
 0x112   :  { %v161_v50 = vperm.slane %v146_v47, %v150_v32 }
 0x114   :  { %v162_v52 = vsel %vm152_vm1, %v161_v50, %v160_v49 }
 0x115   :  { %v165_v53 = vsel %vm163_vm2, %v162_v52, %v159_v51 }
 0x116   :  { %v172_v54 = vsel %vm168_vm3, %v165_v53, 0.0 }
 0x117   :  { %173 = vadd.xlane.f32.xlu1 %v172_v54 }
 0x11e   :  { %v1137_v6 = vpop.permute.xlu1 %571 }
 0x17f   :  { %v171_v55 = vpop.xlane.xlu2 %170 }
 0x180   :  { %v185_v56 = vadd.f32 %v1073_v8, %v171_v55 }
 0x182   :  { %v187_v57 = vmax.f32 %v185_v56, 0.0 }
 0x184   :  { %v323_v58 = vmul.f32 %v1083_v15, %v187_v57  ;;  %v321_v59 = vmul.f32 %v1081_v10, %v187_v57  ;;  %v322_v60 = vmul.f32 %v1086_v1, %v187_v57  ;;  %v328_v61 = vmul.f32 %v1088_v16, %v187_v57 }
 0x185   :  { %v324_v62 = vmul.f32 %v1094_v19, %v187_v57  ;;  %v325_v63 = vmul.f32 %v1090_v17, %v187_v57  ;;  %v331_v24 = vmul.f32 %v1092_v18, %v187_v57  ;;  %v326_v27 = vmul.f32 %v1096_v20, %v187_v57 }
 0x186   :  { %392 = vperm.xlu0 %868, %v323_v58   ;;  %386 = vperm.xlu2 %866, %v321_v59   ;;  %v327_v29 = vmul.f32 %v1102_v23, %v187_v57  ;;  %v334_v35 = vmul.f32 %v1098_v21, %v187_v57  ;;  %v329_v36 = vmul.f32 %v1100_v22, %v187_v57 }
 0x187   :  { %389 = vperm.xlu1 %870, %v322_v60   ;;  %v330_v37 = vmul.f32 %v1106_v26, %v187_v57  ;;  %v332_v39 = vmul.f32 %v1104_v25, %v187_v57  ;;  %v333_v0 = vmul.f32 %v1113_v31, %v187_v57  ;;  %v336_v43 = vmul.f32 %v1120_v41, %v187_v57 }
 0x18a   :  { %v174_v32 = vpop.xlane.xlu1 %173 }
 0x18b   :  { %v186_v33 = vadd.f32 %v1073_v8, %v174_v32  ;;  %v335_v8 = vmul.f32 %v1108_v28, %v187_v57 }
 0x18d   :  { %v188_v38 = vmax.f32 %v186_v33, 0.0 }
 0x18e   :  { %407 = vperm.xlu0 %868, %v328_v61   ;;  %395 = vperm.xlu2 %866, %v324_v62  }
 0x18f   :  { %398 = vperm.xlu1 %870, %v325_v63   ;;  %v337_v40 = vmul.f32 %v1081_v10, %v188_v38  ;;  %v346_v42 = vmul.f32 %v1106_v26, %v188_v38  ;;  %v338_v44 = vmul.f32 %v1086_v1, %v188_v38  ;;  %v340_v45 = vmul.f32 %v1094_v19, %v188_v38 }
 0x190   :  { %v345_v10 = vmul.f32 %v1100_v22, %v188_v38  ;;  %v339_v46 = vmul.f32 %v1083_v15, %v188_v38  ;;  %v349_v47 = vmul.f32 %v1113_v31, %v188_v38  ;;  %v347_v26 = vmul.f32 %v1092_v18, %v188_v38 }
 0x191   :  { %v348_v48 = vmul.f32 %v1104_v25, %v188_v38  ;;  %v343_v1 = vmul.f32 %v1102_v23, %v188_v38  ;;  %v341_v19 = vmul.f32 %v1090_v17, %v188_v38  ;;  %v342_v22 = vmul.f32 %v1096_v20, %v188_v38 }
 0x192   :  { %v352_v15 = vmul.f32 %v1120_v41, %v188_v38  ;;  %v350_v31 = vmul.f32 %v1098_v21, %v188_v38  ;;  %v351_v18 = vmul.f32 %v1108_v28, %v188_v38  ;;  %v344_v25 = vmul.f32 %v1088_v16, %v188_v38 }
 0x196   :  { %416 = vperm.xlu0 %868, %v331_v24   ;;  %401 = vperm.xlu2 %866, %v326_v27  }
 0x197   :  { %404 = vperm.xlu1 %870, %v327_v29  }
 0x19e   :  { %425 = vperm.xlu0 %868, %v334_v35   ;;  %410 = vperm.xlu2 %866, %v329_v36  }
 0x19f   :  { %413 = vperm.xlu1 %870, %v330_v37  }
 0x1a6   :  { %419 = vperm.xlu2 %866, %v332_v39   ;;  %434 = vperm.xlu0 %868, %v337_v40  }
 0x1a7   :  { %422 = vperm.xlu1 %870, %v333_v0  }
 0x1ae   :  { %428 = vperm.xlu2 %866, %v335_v8   ;;  %461 = vperm.xlu0 %868, %v346_v42  }
 0x1af   :  { %431 = vperm.xlu1 %870, %v336_v43  }
 0x1b6   :  { %437 = vperm.xlu2 %866, %v338_v44   ;;  %443 = vperm.xlu0 %868, %v340_v45  }
 0x1b7   :  { %458 = vperm.xlu1 %870, %v345_v10  }
 0x1be   :  { %440 = vperm.xlu2 %866, %v339_v46   ;;  %470 = vperm.xlu0 %868, %v349_v47  }
 0x1bf   :  { %464 = vperm.xlu1 %870, %v347_v26  }
 0x1c6   :  { %467 = vperm.xlu2 %866, %v348_v48   ;;  %452 = vperm.xlu0 %868, %v343_v1  }
 0x1c7   :  { %446 = vperm.xlu1 %870, %v341_v19  }
 0x1ce   :  { %449 = vperm.xlu2 %866, %v342_v22   ;;  %479 = vperm.xlu0 %868, %v352_v15  }
 0x1cf   :  { %473 = vperm.xlu1 %870, %v350_v31  }
 0x1d6   :  { %476 = vperm.xlu2 %866, %v351_v18   ;;  %871 = vset.pattern.permute.xlu0 %v1027_v2 }
 0x1d7   :  { %455 = vperm.xlu1 %870, %v344_v25  }
 0x1e0   :  { %v387_v17 = vpop.permute.xlu2 %386 }
 0x1e1   :  { %v481_v21 = vperm.slane %v387_v17, %v1111_v30 }
 0x1e8   :  { %v396_v23 = vpop.permute.xlu2 %395 }
 0x1e9   :  { %v484_v56 = vperm.slane %v396_v23, %v1111_v30 }
 0x1f0   :  { %v402_v49 = vpop.permute.xlu2 %401 }
 0x1f1   :  { %v486_v60 = vperm.slane %v402_v49, %v1111_v30 }
 0x1f8   :  { %v393_v50 = vpop.permute.xlu0 %392  ;;  %v411_v51 = vpop.permute.xlu2 %410 }
 0x1f9   :  { %v390_v20 = vpop.permute.xlu1 %389  ;;  %v483_v52 = vperm.slane %v393_v50, %v1111_v30  ;;  %v489_v38 = vperm.slane %v411_v51, %v1111_v30 }
 0x1fa   :  { %v482_v41 = vperm.slane %v390_v20, %v1111_v30 }
 0x1fc   :  { %v513_v28 = vsel %vm163_vm2, %v482_v41, %v481_v21 }
 0x1fd   :  { %v515_v2 = vsel %vm514_vm4, %v483_v52, %v513_v28 }
 0x1fe   :  { %v517_v57 = vsel %vm516_vm5, %v484_v56, %v515_v2 }
 0x200   :  { %v408_v53 = vpop.permute.xlu0 %407  ;;  %v420_v54 = vpop.permute.xlu2 %419 }
 0x201   :  { %v399_v16 = vpop.permute.xlu1 %398  ;;  %v488_v63 = vperm.slane %v408_v53, %v1111_v30  ;;  %v492_v44 = vperm.slane %v420_v54, %v1111_v30  ;;  %v662_v54 = vld [vmem:[%s1319_s5 + $0x8] sm:$0xff] }
 0x202   :  { %v485_v55 = vperm.slane %v399_v16, %v1111_v30 }
 0x204   :  { %v519_v58 = vsel %vm518_vm6, %v485_v55, %v517_v57 }
 0x205   :  { %v521_v24 = vsel %vm520_vm7, %v486_v60, %v519_v58 }
 0x208   :  { %v417_v59 = vpop.permute.xlu0 %416  ;;  %v429_v32 = vpop.permute.xlu2 %428 }
 0x209   :  { %v405_v61 = vpop.permute.xlu1 %404  ;;  %v491_v40 = vperm.slane %v417_v59, %v1111_v30  ;;  %v495_v1 = vperm.slane %v429_v32, %v1111_v30 }
 0x20a   :  { %v487_v62 = vperm.slane %v405_v61, %v1111_v30 }
 0x20c   :  { %v523_v27 = vsel %vm522_vm8, %v487_v62, %v521_v24 }
 0x20d   :  { %v525_v29 = vsel %vm524_vm9, %v488_v63, %v523_v27 }
 0x20e   :  { %v552_v33 = vsel %vm551_vm10, %v525_v29, 0.0 }
 0x20f   :  { %553 = vadd.xlane.f32.xlu2 %v552_v33 }
 0x210   :  { %v426_v35 = vpop.permute.xlu0 %425  ;;  %v438_v0 = vpop.permute.xlu2 %437 }
 0x211   :  { %v414_v36 = vpop.permute.xlu1 %413  ;;  %v494_v47 = vperm.slane %v426_v35, %v1111_v30  ;;  %v498_v56 = vperm.slane %v438_v0, %v1111_v30 }
 0x212   :  { %v490_v37 = vperm.slane %v414_v36, %v1111_v30 }
 0x214   :  { %v526_v39 = vsel %vm163_vm2, %v490_v37, %v489_v38 }
 0x215   :  { %v527_v42 = vsel %vm514_vm4, %v491_v40, %v526_v39 }
 0x216   :  { %v528_v10 = vsel %vm516_vm5, %v492_v44, %v527_v42 }
 0x218   :  { %v435_v8 = vpop.permute.xlu0 %434  ;;  %v441_v22 = vpop.permute.xlu2 %440 }
 0x219   :  { %v423_v43 = vpop.permute.xlu1 %422  ;;  %v497_v16 = vperm.slane %v435_v8, %v1111_v30  ;;  %v499_v58 = vperm.slane %v441_v22, %v1111_v30 }
 0x21a   :  { %v493_v45 = vperm.slane %v423_v43, %v1111_v30 }
 0x21b   :  { %v533_v59 = vsel %vm163_vm2, %v498_v56, %v497_v16 }
 0x21c   :  { %v529_v46 = vsel %vm518_vm6, %v493_v45, %v528_v10  ;;  %v534_v33 = vsel %vm514_vm4, %v499_v58, %v533_v59 }
 0x21d   :  { %v530_v48 = vsel %vm520_vm7, %v494_v47, %v529_v46 }
 0x21e   :  { %v531_v31 = vsel %vm522_vm8, %v495_v1, %v530_v48  ;;  %v661_v1 = vld [vmem:[%s1319_s5] sm:$0xff] }
 0x220   :  { %v462_v26 = vpop.permute.xlu0 %461  ;;  %v468_v49 = vpop.permute.xlu2 %467 }
 0x221   :  { %v432_v19 = vpop.permute.xlu1 %431  ;;  %v506_v28 = vperm.slane %v462_v26, %v1111_v30  ;;  %v508_v57 = vperm.slane %v468_v49, %v1111_v30 }
 0x222   :  { %v496_v15 = vperm.slane %v432_v19, %v1111_v30 }
 0x224   :  { %v532_v18 = vsel %vm524_vm9, %v496_v15, %v531_v31 }
 0x225   :  { %v555_v25 = vsel %vm551_vm10, %v532_v18, 0.0 }
 0x226   :  { %556 = vadd.xlane.f32.xlu1 %v555_v25 }
 0x228   :  { %v444_v17 = vpop.permute.xlu0 %443  ;;  %v450_v51 = vpop.permute.xlu2 %449 }
 0x229   :  { %v459_v23 = vpop.permute.xlu1 %458  ;;  %v500_v60 = vperm.slane %v444_v17, %v1111_v30  ;;  %v502_v8 = vperm.slane %v450_v51, %v1111_v30 }
 0x22a   :  { %v505_v41 = vperm.slane %v459_v23, %v1111_v30 }
 0x22b   :  { %v535_v37 = vsel %vm516_vm5, %v500_v60, %v534_v33 }
 0x22c   :  { %v540_v2 = vsel %vm163_vm2, %v506_v28, %v505_v41 }
 0x230   :  { %v471_v50 = vpop.permute.xlu0 %470  ;;  %v477_v61 = vpop.permute.xlu2 %476 }
 0x231   :  { %v465_v20 = vpop.permute.xlu1 %464  ;;  %v509_v63 = vperm.slane %v471_v50, %v1111_v30  ;;  %v511_v35 = vperm.slane %v477_v61, %v1111_v30 }
 0x232   :  { %v507_v52 = vperm.slane %v465_v20, %v1111_v30 }
 0x234   :  { %v541_v55 = vsel %vm514_vm4, %v507_v52, %v540_v2 }
 0x235   :  { %v542_v62 = vsel %vm516_vm5, %v508_v57, %v541_v55 }
 0x236   :  { %v543_v36 = vsel %vm518_vm6, %v509_v63, %v542_v62 }
 0x238   :  { %v453_v21 = vpop.permute.xlu0 %452 }
 0x239   :  { %v447_v53 = vpop.permute.xlu1 %446  ;;  %v503_v45 = vperm.slane %v453_v21, %v1111_v30 }
 0x23a   :  { %v501_v24 = vperm.slane %v447_v53, %v1111_v30 }
 0x23c   :  { %v536_v40 = vsel %vm518_vm6, %v501_v24, %v535_v37 }
 0x23d   :  { %v537_v44 = vsel %vm520_vm7, %v502_v8, %v536_v40  ;;  %v1260_v40 = vstv %s1320_s6  ;;  %s974_s6 = smov [#allocation6]  }
 0x23e   :  { %v538_v47 = vsel %vm522_vm8, %v503_v45, %v537_v44  ;;  %s839_s18 = sshll.u32 %s974_s6, 4  ;;  %s840_s18 = int_to_ptr.vmem [resolvable:$true] %s839_s18 }
 0x23f   :  { %670 = vperm.xlu1 %870, %v662_v54  }
 0x240   :  { %v480_v29 = vpop.permute.xlu0 %479 }
 0x241   :  { %v474_v27 = vpop.permute.xlu1 %473  ;;  %v512_v39 = vperm.slane %v480_v29, %v1111_v30 }
 0x242   :  { %v510_v32 = vperm.slane %v474_v27, %v1111_v30 }
 0x244   :  { %v544_v38 = vsel %vm520_vm7, %v510_v32, %v543_v36 }
 0x245   :  { %v545_v0 = vsel %vm522_vm8, %v511_v35, %v544_v38 }
 0x246   :  { %v546_v42 = vsel %vm524_vm9, %v512_v39, %v545_v0 }
 0x247   :  { %v561_v43 = vsel %vm551_vm10, %v546_v42, 0.0 }
 0x248   :  { %562 = vadd.xlane.f32.xlu2 %v561_v43 }
 0x249   :  { %v456_v10 = vpop.permute.xlu1 %455 }
 0x24a   :  { %v504_v46 = vperm.slane %v456_v10, %v1111_v30 }
 0x24c   :  { %v539_v26 = vsel %vm524_vm9, %v504_v46, %v538_v47 }
 0x24d   :  { %v558_v48 = vsel %vm551_vm10, %v539_v26, 0.0 }
 0x24e   :  { %559 = vadd.xlane.f32.xlu0 %v558_v48 }
 0x260   :  { %665 = vperm.xlu2 %866, %v661_v1  }
 0x262   :  { %577 = vperm.xlu0 %871, %v1078_v9  }
 0x26a   :  { %872 = vset.pattern.permute.xlu0 %v972_v34 }
 0x282   :  { %v554_v19 = vpop.xlane.xlu2 %553 }
 0x283   :  { %v581_v22 = vadd.f32 %v1137_v6, %v554_v19 }
 0x285   :  { %v585_v30 = vsub.f32 0.0, %v581_v22 }
 0x287   :  { %v589_v15 = vmul.f32 1.442695, %v585_v30 }
 0x289   :  { %877 = vpow2.f32 %v589_v15 }
 0x28f   :  { %v878_v31 = vpop.eup %877 }
 0x290   :  { %v597_v18 = vadd.f32 1.0, %v878_v31 }
 0x292   :  { %879 = vrcp.f32 %v597_v18  ;;  %v612_v49 = vand.u32 2147483648, %v597_v18  ;;  %v610_v20 = vand.u32 2147483647, %v597_v18  ;;  %vm606_vm12 = vweird.f32 %v597_v18 }
 0x294   :  { %v613_v34 = vor.u32 1.1754944e-38, %v612_v49  ;;  %vm611_vm14 = vcmp.eq.f32.partialorder %v610_v20, 8.507059e+37 }
 0x298   :  { %v880_v25 = vpop.eup %879 }
 0x299   :  { %v602_v17 = vmul.f32 %v880_v25, %v597_v18  ;;  %vm607_vm11 = vweird.f32 %v880_v25  ;;  %v557_v21 = vpop.xlane.xlu1 %556 }
 0x29a   :  { %vm608_vm13 = vmor %vm606_vm12, %vm607_vm11 }
 0x29b   :  { %v603_v23 = vsub.f32 1.0, %v602_v17 }
 0x29d   :  { %v604_v50 = vmul.f32 %v880_v25, %v603_v23 }
 0x29f   :  { %v605_v51 = vadd.f32 %v880_v25, %v604_v50 }
 0x2a1   :  { %v609_v9 = vsel %vm608_vm13, %v880_v25, %v605_v51 }
 0x2a2   :  { %v614_v41 = vsel %vm611_vm14, %v613_v34, %v609_v9 }
 0x2a3   :  { %793 = vperm.xlu2 %866, %v614_v41  }
 0x2b1   :  { %v1240_v53 = vpop.permute.xlu1 %670 }
 0x2b2   :  { %v675_v2 = vmul.f32 %v1240_v53, %v1049_v13  ;;  %v676_v55 = vmul.f32 %v1240_v53, %v1051_v14  ;;  %v680_v59 = vmul.f32 %v1240_v53, %v1047_v12 }
 0x2bb   :  { %v563_v52 = vpop.xlane.xlu2 %562 }
 0x2c1   :  { %v560_v28 = vpop.xlane.xlu0 %559 }
 0x2c2   :  { %v583_v16 = vadd.f32 %v1137_v6, %v560_v28 }
 0x2c3   :  { %v1245_v54 = vpop.permute.xlu2 %665 }
 0x2c4   :  { %v587_v56 = vsub.f32 0.0, %v583_v16  ;;  %v673_v57 = vmul.f32 %v1245_v54, %v1034_v5  ;;  %v674_v58 = vmul.f32 %v1245_v54, %v1038_v7  ;;  %v678_v6 = vmul.f32 %v1245_v54, %v1032_v4 }
 0x2c6   :  { %v593_v60 = vmul.f32 1.442695, %v587_v56  ;;  %v681_v13 = vadd.f32 %v675_v2, %v673_v57  ;;  %v688_v61 = vadd.f32 %v676_v55, %v674_v58  ;;  %v702_v62 = vadd.f32 %v680_v59, %v678_v6 }
 0x2c7   :  { %v677_v55 = vmul.f32 %v1245_v54, %v1030_v3  ;;  %v679_v58 = vmul.f32 %v1240_v53, %v1045_v11 }
 0x2c8   :  { %881 = vpow2.f32 %v593_v60  ;;  %v682_v63 = vrot.slane %v681_v13, 4  ;;  %v689_v14 = vrot.slane %v688_v61, 4  ;;  %v703_v24 = vrot.slane %v702_v62, 4 }
 0x2c9   :  { %v695_v6 = vadd.f32 %v679_v58, %v677_v55 }
 0x2ca   :  { %v683_v27 = vadd.f32 %v682_v63, %v681_v13  ;;  %v690_v29 = vadd.f32 %v689_v14, %v688_v61  ;;  %v704_v5 = vadd.f32 %v703_v24, %v702_v62 }
 0x2cb   :  { %v696_v3 = vrot.slane %v695_v6, 4 }
 0x2cc   :  { %v684_v32 = vrot.slane %v683_v27, 2  ;;  %v691_v33 = vrot.slane %v690_v29, 2  ;;  %v705_v7 = vrot.slane %v704_v5, 2 }
 0x2cd   :  { %v697_v53 = vadd.f32 %v696_v3, %v695_v6 }
 0x2ce   :  { %v882_v35 = vpop.eup %881  ;;  %v685_v36 = vadd.f32 %v684_v32, %v683_v27  ;;  %v692_v12 = vadd.f32 %v691_v33, %v690_v29  ;;  %v706_v38 = vadd.f32 %v705_v7, %v704_v5 }
 0x2cf   :  { %v599_v37 = vadd.f32 1.0, %v882_v35 }
 0x2d0   :  { %v686_v4 = vrot.slane %v685_v36, 1  ;;  %v693_v39 = vrot.slane %v692_v12, 1  ;;  %v707_v0 = vrot.slane %v706_v38, 1 }
 0x2d1   :  { %883 = vrcp.f32 %v599_v37  ;;  %v642_v49 = vand.u32 2147483648, %v599_v37  ;;  %v640_v20 = vand.u32 2147483647, %v599_v37  ;;  %vm636_vm0 = vweird.f32 %v599_v37 }
 0x2d2   :  { %v687_v8 = vadd.f32 %v686_v4, %v685_v36  ;;  %v694_v42 = vadd.f32 %v693_v39, %v692_v12  ;;  %v708_v43 = vadd.f32 %v707_v0, %v706_v38  ;;  %v698_v12 = vrot.slane %v697_v53, 2 }
 0x2d3   :  { %v643_v34 = vor.u32 1.1754944e-38, %v642_v49  ;;  %vm641_vm2 = vcmp.eq.f32.partialorder %v640_v20, 8.507059e+37 }
 0x2d4   :  { %v711_v44 = vadd.f32 %v1260_v40, %v687_v8  ;;  %v712_v45 = vadd.f32 %v1260_v40, %v694_v42  ;;  %v578_v10 = vpop.permute.xlu0 %577  ;;  %v1265_v46 = vadd.f32 %v1260_v40, %v708_v43 }
 0x2d5   :  { %v582_v47 = vadd.f32 %v578_v10, %v557_v21  ;;  %v584_v26 = vadd.f32 %v578_v10, %v563_v52 }
 0x2d6   :  { %v715_v48 = vsub.f32 0.0, %v711_v44  ;;  %v716_v1 = vsub.f32 0.0, %v712_v45  ;;  %v718_v55 = vsub.f32 0.0, %v1265_v46 }
 0x2d7   :  { %v884_v19 = vpop.eup %883  ;;  %v586_v22 = vsub.f32 0.0, %v582_v47  ;;  %v588_v30 = vsub.f32 0.0, %v584_v26 }
 0x2d8   :  { %v719_v15 = vmul.f32 1.442695, %v715_v48  ;;  %v721_v31 = vmul.f32 1.442695, %v716_v1  ;;  %v632_v18 = vmul.f32 %v884_v19, %v599_v37  ;;  %vm637_vm15 = vweird.f32 %v884_v19 }
 0x2d9   :  { %v591_v25 = vmul.f32 1.442695, %v586_v22  ;;  %v595_v23 = vmul.f32 1.442695, %v588_v30  ;;  %vm638_vm1 = vmor %vm636_vm0, %vm637_vm15  ;;  %v699_v48 = vadd.f32 %v698_v12, %v697_v53 }
 0x2da   :  { %885 = vpow2.f32 %v719_v15  ;;  %v633_v17 = vsub.f32 1.0, %v632_v18 }
 0x2db   :  { %887 = vpow2.f32 %v721_v31 }
 0x2dc   :  { %v634_v50 = vmul.f32 %v884_v19, %v633_v17  ;;  %889 = vpow2.f32 %v591_v25 }
 0x2dd   :  { %891 = vpow2.f32 %v595_v23 }
 0x2de   :  { %v635_v51 = vadd.f32 %v884_v19, %v634_v50  ;;  %v700_v50 = vrot.slane %v699_v48, 1 }
 0x2e0   :  { %v886_v9 = vpop.eup %885  ;;  %v639_v41 = vsel %vm638_vm1, %v884_v19, %v635_v51 }
 0x2e1   :  { %v888_v21 = vpop.eup %887  ;;  %v644_v52 = vsel %vm641_vm2, %v643_v34, %v639_v41  ;;  %v1267_v28 = vadd.f32 1.0, %v886_v9  ;;  %v909_v9 = vld [vmem:[#allocation3] sm:$0xff] }
 0x2e2   :  { %803 = vperm.xlu2 %866, %v644_v52   ;;  %v1269_v16 = vadd.f32 1.0, %v888_v21  ;;  %v890_v2 = vpop.eup %889  ;;  %v910_v21 = vld [vmem:[#allocation3 + $0x8] sm:$0xff] }
 0x2e3   :  { %893 = vrcp.f32 %v1267_v28  ;;  %v892_v56 = vpop.eup %891  ;;  %v598_v57 = vadd.f32 1.0, %v890_v2  ;;  %vm736_vm7 = vweird.f32 %v1267_v28  ;;  %v740_v43 = vand.u32 2147483647, %v1267_v28 }
 0x2e4   :  { %895 = vrcp.f32 %v1269_v16  ;;  %v1277_v59 = vadd.f32 1.0, %v892_v56  ;;  %v742_v44 = vand.u32 2147483648, %v1267_v28  ;;  %v757_v45 = vand.u32 2147483648, %v1269_v16 }
 0x2e5   :  { %897 = vrcp.f32 %v598_v57  ;;  %v625_v5 = vand.u32 2147483647, %v598_v57  ;;  %v627_v32 = vand.u32 2147483648, %v598_v57  ;;  %vm621_vm4 = vweird.f32 %v598_v57 }
 0x2e6   :  { %899 = vrcp.f32 %v1277_v59  ;;  %vm751_vm11 = vweird.f32 %v1269_v16  ;;  %v755_v47 = vand.u32 2147483647, %v1269_v16  ;;  %v657_v1 = vand.u32 2147483648, %v1277_v59 }
 0x2e7   :  { %vm626_vm6 = vcmp.eq.f32.partialorder %v625_v5, 8.507059e+37  ;;  %v628_v4 = vor.u32 1.1754944e-38, %v627_v32  ;;  %vm651_vm14 = vweird.f32 %v1277_v59  ;;  %v655_v30 = vand.u32 2147483647, %v1277_v59 }
 0x2e8   :  { %v743_v15 = vor.u32 1.1754944e-38, %v742_v44  ;;  %v758_v31 = vor.u32 1.1754944e-38, %v757_v45  ;;  %vm741_vm0 = vcmp.eq.f32.partialorder %v740_v43, 8.507059e+37  ;;  %vm756_vm1 = vcmp.eq.f32.partialorder %v755_v47, 8.507059e+37  ;;  %v913_v45 = vld [vmem:[#allocation3 + $0x10] sm:$0xff]  ;;  %v914_v47 = vld [vmem:[#allocation3 + $0x18] sm:$0xff] }
 0x2e9   :  { %v894_v60 = vpop.eup %893  ;;  %v658_v49 = vor.u32 1.1754944e-38, %v657_v1  ;;  %vm656_vm2 = vcmp.eq.f32.partialorder %v655_v30, 8.507059e+37 }
 0x2ea   :  { %v896_v13 = vpop.eup %895  ;;  %v732_v61 = vmul.f32 %v894_v60, %v1267_v28  ;;  %vm737_vm8 = vweird.f32 %v894_v60  ;;  %v701_v28 = vadd.f32 %v700_v50, %v699_v48 }
 0x2eb   :  { %v747_v62 = vmul.f32 %v896_v13, %v1269_v16  ;;  %v898_v54 = vpop.eup %897  ;;  %vm752_vm9 = vweird.f32 %v896_v13  ;;  %vm1287_vm10 = vmor %vm736_vm7, %vm737_vm8 }
 0x2ec   :  { %v900_v63 = vpop.eup %899  ;;  %v617_v14 = vmul.f32 %v898_v54, %v598_v57  ;;  %v733_v24 = vsub.f32 1.0, %v732_v61  ;;  %vm622_vm3 = vweird.f32 %v898_v54  ;;  %vm753_vm13 = vmor %vm751_vm11, %vm752_vm9  ;;  %v713_v16 = vadd.f32 %v1260_v40, %v701_v28 }
 0x2ed   :  { %v748_v27 = vsub.f32 1.0, %v747_v62  ;;  %v647_v11 = vmul.f32 %v900_v63, %v1277_v59  ;;  %vm623_vm5 = vmor %vm621_vm4, %vm622_vm3  ;;  %vm652_vm12 = vweird.f32 %v900_v63  ;;  %v725_v57 = vmul.f32 1.442695, %v718_v55 }
 0x2ee   :  { %v618_v29 = vsub.f32 1.0, %v617_v14  ;;  %v734_v35 = vmul.f32 %v894_v60, %v733_v24  ;;  %vm653_vm15 = vmor %vm651_vm14, %vm652_vm12  ;;  %v717_v2 = vsub.f32 0.0, %v713_v16 }
 0x2ef   :  { %v648_v33 = vsub.f32 1.0, %v647_v11  ;;  %v749_v36 = vmul.f32 %v896_v13, %v748_v27 }
 0x2f0   :  { %v619_v7 = vmul.f32 %v898_v54, %v618_v29  ;;  %v735_v0 = vadd.f32 %v894_v60, %v734_v35  ;;  %v723_v56 = vmul.f32 1.442695, %v717_v2 }
 0x2f1   :  { %v649_v38 = vmul.f32 %v900_v63, %v648_v33  ;;  %v750_v8 = vadd.f32 %v896_v13, %v749_v36 }
 0x2f2   :  { %v620_v37 = vadd.f32 %v898_v54, %v619_v7  ;;  %v739_v19 = vsel %vm1287_vm10, %v894_v60, %v735_v0  ;;  %901 = vpow2.f32 %v723_v56  ;;  %v912_v0 = vld [vmem:[#allocation3 + $0x28] sm:$0xff] }
 0x2f3   :  { %v650_v26 = vadd.f32 %v900_v63, %v649_v38  ;;  %v754_v22 = vsel %vm753_vm13, %v896_v13, %v750_v8  ;;  %v1298_v25 = vsel %vm741_vm0, %v743_v15, %v739_v19  ;;  %903 = vpow2.f32 %v725_v57  ;;  %v916_v15 = vld [vmem:[#allocation3 + $0x38] sm:$0xff] }
 0x2f4   :  { %v624_v39 = vsel %vm623_vm5, %v898_v54, %v620_v37  ;;  %v1300_v17 = vsel %vm756_vm1, %v758_v31, %v754_v22  ;;  %v915_v22 = vld [vmem:[#allocation3 + $0x30] sm:$0xff] }
 0x2f5   :  { %v629_v42 = vsel %vm626_vm6, %v628_v4, %v624_v39  ;;  %v654_v18 = vsel %vm653_vm15, %v900_v63, %v650_v26  ;;  %v911_v4 = vld [vmem:[#allocation3 + $0x20] sm:$0xff] }
 0x2f6   :  { %798 = vperm.xlu1 %870, %v629_v42   ;;  %v659_v34 = vsel %vm656_vm2, %v658_v49, %v654_v18 }
 0x2f8   :  { %v902_v58 = vpop.eup %901 }
 0x2f9   :  { %v904_v59 = vpop.eup %903  ;;  %v729_v6 = vadd.f32 1.0, %v902_v58 }
 0x2fa   :  { %v730_v60 = vadd.f32 1.0, %v904_v59 }
 0x2fb   :  { %905 = vrcp.f32 %v729_v6  ;;  %vm766_vm5 = vweird.f32 %v729_v6  ;;  %v772_v27 = vand.u32 2147483648, %v729_v6  ;;  %v770_v53 = vand.u32 2147483647, %v729_v6 }
 0x2fc   :  { %907 = vrcp.f32 %v730_v60  ;;  %v787_v11 = vand.u32 2147483648, %v730_v60  ;;  %vm781_vm7 = vweird.f32 %v730_v60  ;;  %v785_v29 = vand.u32 2147483647, %v730_v60 }
 0x2fd   :  { %v794_v23 = vpop.permute.xlu2 %793  ;;  %v773_v33 = vor.u32 1.1754944e-38, %v772_v27  ;;  %vm771_vm9 = vcmp.eq.f32.partialorder %v770_v53, 8.507059e+37 }
 0x2fe   :  { %v811_v20 = vadd.f32 %v794_v23, %v1298_v25  ;;  %v812_v51 = vadd.f32 %v794_v23, %v1300_v17  ;;  %808 = vperm.xlu1 %870, %v659_v34   ;;  %v788_v7 = vor.u32 1.1754944e-38, %v787_v11  ;;  %vm786_vm10 = vcmp.eq.f32.partialorder %v785_v29, 8.507059e+37 }
 0x300   :  { %v819_v41 = vmul.f32 %v909_v9, %v811_v20  ;;  %v820_v52 = vmul.f32 %v910_v21, %v812_v51 }
 0x301   :  { %v906_v13 = vpop.eup %905 }
 0x302   :  { %827 = vst [vmem:[#allocation6] sm:$0xff] %v819_v41  ;;  %v908_v61 = vpop.eup %907  ;;  %v762_v62 = vmul.f32 %v906_v13, %v729_v6  ;;  %vm767_vm3 = vweird.f32 %v906_v13 }
 0x303   :  { %828 = vst [vmem:[#allocation6 + $0x8] sm:$0xff] %v820_v52  ;;  %v777_v3 = vmul.f32 %v908_v61, %v730_v60  ;;  %vm782_vm4 = vweird.f32 %v908_v61  ;;  %vm768_vm6 = vmor %vm766_vm5, %vm767_vm3 }
 0x304   :  { %v763_v54 = vsub.f32 1.0, %v762_v62  ;;  %vm783_vm8 = vmor %vm781_vm7, %vm782_vm4 }
 0x305   :  { %v778_v63 = vsub.f32 1.0, %v777_v3 }
 0x306   :  { %v764_v40 = vmul.f32 %v906_v13, %v763_v54 }
 0x307   :  { %v779_v14 = vmul.f32 %v908_v61, %v778_v63 }
 0x308   :  { %v765_v46 = vadd.f32 %v906_v13, %v764_v40 }
 0x309   :  { %v780_v24 = vadd.f32 %v908_v61, %v779_v14 }
 0x30a   :  { %v769_v5 = vsel %vm768_vm6, %v906_v13, %v765_v46 }
 0x30b   :  { %v784_v32 = vsel %vm783_vm8, %v908_v61, %v780_v24  ;;  %v774_v35 = vsel %vm771_vm9, %v773_v33, %v769_v5 }
 0x30c   :  { %v789_v36 = vsel %vm786_vm10, %v788_v7, %v784_v32 }
 0x33c   :  { %v804_v12 = vpop.permute.xlu2 %803 }
 0x33d   :  { %v815_v37 = vadd.f32 %v804_v12, %v774_v35  ;;  %v816_v38 = vadd.f32 %v804_v12, %v789_v36 }
 0x33f   :  { %v823_v39 = vmul.f32 %v911_v4, %v815_v37  ;;  %v824_v8 = vmul.f32 %v912_v0, %v816_v38 }
 0x341   :  { %831 = vst [vmem:[#allocation6 + $0x20] sm:$0xff] %v823_v39 }
 0x342   :  { %832 = vst [vmem:[#allocation6 + $0x28] sm:$0xff] %v824_v8 }
 0x368   :  { %v799_v42 = vpop.permute.xlu1 %798 }
 0x369   :  { %v813_v43 = vadd.f32 %v799_v42, %v1298_v25  ;;  %v814_v44 = vadd.f32 %v799_v42, %v1300_v17 }
 0x36b   :  { %v821_v10 = vmul.f32 %v913_v45, %v813_v43  ;;  %v822_v26 = vmul.f32 %v914_v47, %v814_v44 }
 0x36d   :  { %829 = vst [vmem:[#allocation6 + $0x10] sm:$0xff] %v821_v10 }
 0x36e   :  { %830 = vst [vmem:[#allocation6 + $0x18] sm:$0xff] %v822_v26 }
 0x370   :  { %v809_v48 = vpop.permute.xlu1 %808 }
 0x371   :  { %v817_v1 = vadd.f32 %v809_v48, %v774_v35  ;;  %v818_v19 = vadd.f32 %v809_v48, %v789_v36 }
 0x373   :  { %v825_v30 = vmul.f32 %v915_v22, %v817_v1  ;;  %v826_v31 = vmul.f32 %v916_v15, %v818_v19 }
 0x375   :  { %833 = vst [vmem:[#allocation6 + $0x30] sm:$0xff] %v825_v30 }
 0x376   :  { %834 = vst [vmem:[#allocation6 + $0x38] sm:$0xff] %v826_v31 }
 0x377   :  { %847 = dma.vmem_to_hbm [thread:$0]  %s840_s18, 1024, %s842_s21, [#allocation5], %s970_s29, %s970_s29, %s971_s30  }
 0x378   :  { %967 = dma.done.wait [#allocation5], 1024  }
 0x379   :  { %968 = vsyncadd [#allocation5], 4294966272 }
 0x37a   :  { %852 = vsyncpa [#allocation4], 1 }
 0x37b   :  { %853 = vsyncpa [#allocation5], 1 }

</bundles_post_ra>
